<compile_context>
chip_gen: v6e
topology: v6e:2x2x1
jax: 0.10.0
libtpu: 0.0.40
codegen_flags: <defaults>
</compile_context>

<pallas_src>
import jax
import jax.numpy as jnp
from jax.experimental import pallas as pl
from jax.experimental.pallas import tpu as pltpu


def _hbm_copy_kernel(src_ref, dst_ref, sem):
    # Identity: the empty reference forward performs no compute on the input.
    # Single HBM->HBM DMA; no VMEM staging, no vector loads/stores.
    cp = pltpu.make_async_copy(src_ref, dst_ref, sem)
    cp.start()
    cp.wait()


def stage_voxels(data):
    """Identity-copy an [N, F] voxel tensor via one HBM->HBM DMA.

    Exactly two HBM passes (read + write) -- the minimum for a copy -- with
    no padding, reshaping, slicing, or VMEM round trip on either side of the
    pallas_call.  Works for ragged N / F on every TPU generation.
    """
    n, f = data.shape
    nbytes = int(data.size) * data.dtype.itemsize
    return pl.pallas_call(
        _hbm_copy_kernel,
        out_shape=jax.ShapeDtypeStruct((n, f), data.dtype),
        in_specs=[pl.BlockSpec(memory_space=pl.ANY)],
        out_specs=pl.BlockSpec(memory_space=pl.ANY),
        scratch_shapes=[pltpu.SemaphoreType.DMA(())],
        cost_estimate=pl.CostEstimate(
            flops=0, transcendentals=0, bytes_accessed=2 * nbytes
        ),
    )(data)


class ChainPallas:
    """Pallas port of mlreco.models.chain_gnn.Chain."""

    MODULES = ['dbscan', 'uresnet_ppn', 'attention_gnn']

    def __init__(self, model_config):
        # Reference __init__ is `pass`: no parameters / sub-networks created.
        pass

    def forward(self, data):
        # Reference forward is `pass`: no compute, returns None.  We launch
        # no kernel here -- any copy would be dead work immediately discarded.
        # TODO(synk): UResNet voxel labels, PPN points, DBSCAN clustering and
        # attention-GNN grouping are undefined in the reference module, so the
        # chain stages cannot be translated.
        return None


if __name__ == "__main__":
    key = jax.random.PRNGKey(0)
    # Ragged voxel count (not a multiple of 8) exercises the arbitrary-shape
    # DMA path.  Columns: (x, y, z, batch_id, energy).
    n_voxels, n_feats = 123, 5
    k1, k2 = jax.random.split(key)
    coords = jax.random.randint(k1, (n_voxels, 4), 0, 16).astype(jnp.float32)
    energy = jax.random.uniform(k2, (n_voxels, 1), dtype=jnp.float32)
    data = jnp.concatenate([coords, energy], axis=1)  # [N, 5]

    model = ChainPallas(model_config={})
    result = model.forward(data)
    assert result is None  # exact semantics of the empty PyTorch forward

    # Verify the standalone Pallas staging kernel (identity HBM->HBM DMA).
    staged = jax.block_until_ready(stage_voxels(data))
    assert staged.shape == data.shape and staged.dtype == data.dtype
    assert bool(jnp.all(staged == data))
    print("KERNEL_OK")
</pallas_src>

<mosaic_0001>
module attributes {stable_mosaic.version = 11 : i64} {
  func.func @_hbm_copy_kernel(%arg0: memref<123x5xf32, #tpu.memory_space<any>>, %arg1: memref<123x5xf32, #tpu.memory_space<any>>, %arg2: memref<!tpu.dma_semaphore, #tpu.memory_space<semaphore_mem>>) attributes {dimension_semantics = [], scalar_prefetch = 0 : i64, scratch_operands = 1 : i64, tpu.core_type = #tpu.core_type<tc>} {
    tpu.enqueue_dma source(%arg0 : memref<123x5xf32, #tpu.memory_space<any>>) target(%arg1 : memref<123x5xf32, #tpu.memory_space<any>>) target_semaphore(%arg2 : memref<!tpu.dma_semaphore, #tpu.memory_space<semaphore_mem>>)
    tpu.wait_dma2 semaphore(%arg2 : memref<!tpu.dma_semaphore, #tpu.memory_space<semaphore_mem>>) src(%arg0 : memref<123x5xf32, #tpu.memory_space<any>>) dst(%arg1 : memref<123x5xf32, #tpu.memory_space<any>>)
    return
  }
}

</mosaic_0001>

<bundles_post_ra>
// kernel: tpu_custom_call.1
= control target key start
LH: loop header
LB: loop body
LE: loop exit
PB: predicated region body
PF: predicated region fallthrough
CT: control target
= control target key end

     0   :  { %s224_s0 = inlined_call_operand.vmem [shape: f32[123,5], index: 0, kind: input, shape index: {}]   ;;  %s225_s1 = inlined_call_operand.vmem [shape: f32[123,5], index: 1, kind: output, shape index: {}]  }
   0x1   :  { %v44_v0 = vld [vmem:[%s224_s0] sm:$0xff]  ;;  %v46_v1 = vld [vmem:[%s224_s0 + $0x8] sm:$0xff]  ;;  %v48_v2 = vld [vmem:[%s224_s0 + $0x10] sm:$0xff] }
   0x2   :  { %45 = vst [vmem:[%s225_s1] sm:$0xff] %v44_v0  ;;  %47 = vst [vmem:[%s225_s1 + $0x8] sm:$0xff] %v46_v1  ;;  %v50_v3 = vld [vmem:[%s224_s0 + $0x18] sm:$0xff]  ;;  %v52_v4 = vld [vmem:[%s224_s0 + $0x20] sm:$0xff] }
   0x3   :  { %49 = vst [vmem:[%s225_s1 + $0x10] sm:$0xff] %v48_v2  ;;  %v54_v5 = vld [vmem:[%s224_s0 + $0x28] sm:$0xff]  ;;  %51 = vst [vmem:[%s225_s1 + $0x18] sm:$0xff] %v50_v3  ;;  %v56_v6 = vld [vmem:[%s224_s0 + $0x30] sm:$0xff] }
   0x4   :  { %53 = vst [vmem:[%s225_s1 + $0x20] sm:$0xff] %v52_v4  ;;  %55 = vst [vmem:[%s225_s1 + $0x28] sm:$0xff] %v54_v5  ;;  %v58_v7 = vld [vmem:[%s224_s0 + $0x38] sm:$0xff]  ;;  %v60_v8 = vld [vmem:[%s224_s0 + $0x40] sm:$0xff] }
   0x5   :  { %57 = vst [vmem:[%s225_s1 + $0x30] sm:$0xff] %v56_v6  ;;  %59 = vst [vmem:[%s225_s1 + $0x38] sm:$0xff] %v58_v7  ;;  %v62_v9 = vld [vmem:[%s224_s0 + $0x48] sm:$0xff]  ;;  %v64_v10 = vld [vmem:[%s224_s0 + $0x50] sm:$0xff] }
   0x6   :  { %61 = vst [vmem:[%s225_s1 + $0x40] sm:$0xff] %v60_v8  ;;  %v66_v11 = vld [vmem:[%s224_s0 + $0x58] sm:$0xff]  ;;  %63 = vst [vmem:[%s225_s1 + $0x48] sm:$0xff] %v62_v9  ;;  %v68_v12 = vld [vmem:[%s224_s0 + $0x60] sm:$0xff] }
   0x7   :  { %65 = vst [vmem:[%s225_s1 + $0x50] sm:$0xff] %v64_v10  ;;  %67 = vst [vmem:[%s225_s1 + $0x58] sm:$0xff] %v66_v11  ;;  %v70_v13 = vld [vmem:[%s224_s0 + $0x68] sm:$0xff]  ;;  %v72_v14 = vld [vmem:[%s224_s0 + $0x70] sm:$0xff] }
   0x8   :  { %69 = vst [vmem:[%s225_s1 + $0x60] sm:$0xff] %v68_v12  ;;  %71 = vst [vmem:[%s225_s1 + $0x68] sm:$0xff] %v70_v13  ;;  %v113_v15 = vld [vmem:[%s224_s0 + $0x78] sm:$0x7] }
   0x9   :  { %73 = vst [vmem:[%s225_s1 + $0x70] sm:$0xff] %v72_v14  ;;  %114 = vst [vmem:[%s225_s1 + $0x78] sm:$0x7] %v113_v15 }
   0xa   :  { %89 = vsyncadd [#allocation2], 1968 }
   0xb   :  { %116 = dma.done.wait [#allocation2], 1968 }
   0xc   :  { %117 = vsyncadd [#allocation2], 4294965328 }
   0xd   :  { %93 = vsyncmov [#allocation2] }
  0x10   :  { %s94_s12 = vpop.sfrf %93 }
  0x11   :  { %p115_p0 = scmp.ne.s32.totalorder %s94_s12, 0 }
  0x13   :  { %98 = shalt.err (%p115_p0)  }

</bundles_post_ra>
